<compile_context>
chip_gen: v5e
topology: v5e:2x2
jax: 0.10.0
libtpu: 0.0.40
codegen_flags: <defaults>
</compile_context>

<pallas_src>
import functools

import jax
import jax.numpy as jnp
from jax.experimental import pallas as pl
from jax.experimental.pallas import tpu as pltpu

LANE = 128       # each packed layer occupies one 128-lane slot of the slab
SUBLANE = 8


def _round_up(x, m):
    return (x + m - 1) // m * m


def pack_params(p, dtype=jnp.float32):
    """Pack the six Linear layers into one (128, 512) weight slab + one bias row.

    Slab layout (rows = contraction dim, padded to 128; cols = 4 slots x 128 lanes):
      slot 0: fc1                       rows [0, state_size)
      slot 1: fc2                       rows [0, fc1)
      slot 2: [val_fc1 | adv_fc1]       rows [0, fc2)
      slot 3: block-diagonal head       rows [vh, vh+ah) -> adv_fc2 in cols [0, A)
                                        rows [0, vh)     -> val_fc2 in col  A
    All unused rows/cols are zero, so every in-kernel dot can contract over the
    full 128-row slot with no lane slicing (zero padding contributes nothing).
    Biases stay f32 (bias-add / ReLU are done in f32 regardless of `dtype`).
    """
    state_size, fc1 = p["w1"].shape
    fc2 = p["w2"].shape[1]
    vh = p["wv1"].shape[1]
    ah = p["wa1"].shape[1]
    action_size = p["wa2"].shape[1]

    ss_pad = _round_up(state_size, SUBLANE)
    a_pad = _round_up(action_size, SUBLANE)
    assert fc1 <= LANE and fc2 <= LANE and vh + ah <= LANE
    assert action_size + 1 <= LANE and ss_pad <= LANE and a_pad <= LANE

    K, N = LANE, 4 * LANE
    W = jnp.zeros((K, N), jnp.float32)
    b = jnp.zeros((1, N), jnp.float32)

    # slot 0: fc1
    W = W.at[:state_size, 0:fc1].set(p["w1"])
    b = b.at[:, 0:fc1].set(p["b1"])
    # slot 1: fc2
    W = W.at[:fc1, LANE:LANE + fc2].set(p["w2"])
    b = b.at[:, LANE:LANE + fc2].set(p["b2"])
    # slot 2: fused value/advantage hidden layer  [wv1 | wa1]
    W = W.at[:fc2, 2 * LANE:2 * LANE + vh].set(p["wv1"])
    W = W.at[:fc2, 2 * LANE + vh:2 * LANE + vh + ah].set(p["wa1"])
    b = b.at[:, 2 * LANE:2 * LANE + vh].set(p["bv1"])
    b = b.at[:, 2 * LANE + vh:2 * LANE + vh + ah].set(p["ba1"])
    # slot 3: block-diagonal second stage -> [advantage (A) | value (1) | zeros]
    W = W.at[vh:vh + ah, 3 * LANE:3 * LANE + action_size].set(p["wa2"])
    W = W.at[:vh, 3 * LANE + action_size:3 * LANE + action_size + 1].set(p["wv2"])
    b = b.at[:, 3 * LANE:3 * LANE + action_size].set(p["ba2"])
    b = b.at[:, 3 * LANE + action_size:3 * LANE + action_size + 1].set(p["bv2"])

    meta = dict(state_size=state_size, ss_pad=ss_pad,
                action_size=action_size, a_pad=a_pad,
                fc1=fc1, fc2=fc2, vh=vh, ah=ah)
    return W.astype(dtype), b, meta


def _forward_streams(x, w_ref, b_ref, ss_pad):
    """Shared 4-matmul pipeline. Returns s2 = [z | value | 0...] of shape (TB, 128), f32."""
    cd = w_ref.dtype   # compute dtype fed to the MXU (f32 or bf16); accumulation is f32
    # fc1 + relu  (only layer that slices rows, so `state` can stay narrow)
    h = jnp.dot(x, w_ref[:ss_pad, 0:LANE], preferred_element_type=jnp.float32)
    h = jnp.maximum(h + b_ref[:, 0:LANE], 0.0)
    # fc2 + relu — full-slot (128,128) dot; zero-padded rows/lanes contribute nothing
    h = jnp.dot(h.astype(cd), w_ref[:, LANE:2 * LANE], preferred_element_type=jnp.float32)
    h = jnp.maximum(h + b_ref[:, LANE:2 * LANE], 0.0)
    # fused [value | advantage] hidden layer + relu
    h = jnp.dot(h.astype(cd), w_ref[:, 2 * LANE:3 * LANE], preferred_element_type=jnp.float32)
    h = jnp.maximum(h + b_ref[:, 2 * LANE:3 * LANE], 0.0)
    # fused block-diagonal head: cols [0, A) = z (no relu), col A = value (pre-relu)
    s2 = jnp.dot(h.astype(cd), w_ref[:, 3 * LANE:4 * LANE], preferred_element_type=jnp.float32)
    return s2 + b_ref[:, 3 * LANE:4 * LANE]


def _dueling_kernel_fused(state_ref, w_ref, b_ref, q_ref, *, meta, batch, tile_b):
    """Single-tile fast path: whole batch in one grid step, global mean fused in-kernel."""
    ss_pad, A, A_pad = meta["ss_pad"], meta["action_size"], meta["a_pad"]
    s2 = _forward_streams(state_ref[...], w_ref, b_ref, ss_pad)
    v = jnp.maximum(s2[:, A:A + 1], 0.0)                       # relu'd value head (TB, 1)

    row = jax.lax.broadcasted_iota(jnp.int32, (tile_b, A_pad), 0)
    col = jax.lax.broadcasted_iota(jnp.int32, (tile_b, A_pad), 1)
    z_masked = jnp.where((row < batch) & (col < A), s2[:, :A_pad], 0.0)
    z_mean = jnp.sum(z_masked) * (1.0 / (batch * A))           # global torch z.mean()

    q_ref[...] = (s2[:, :A_pad] + v - z_mean).astype(q_ref.dtype)


def _dueling_kernel_tiled(state_ref, w_ref, b_ref, q_ref, psum_ref, *, meta, batch, tile_b):
    """Multi-tile path: per-tile masked partial column sums of z; mean applied in wrapper."""
    ss_pad, A, A_pad = meta["ss_pad"], meta["action_size"], meta["a_pad"]
    s2 = _forward_streams(state_ref[...], w_ref, b_ref, ss_pad)
    v = jnp.maximum(s2[:, A:A + 1], 0.0)

    q_ref[...] = (s2[:, :A_pad] + v).astype(q_ref.dtype)

    i = pl.program_id(0)
    row = jax.lax.broadcasted_iota(jnp.int32, (tile_b, A_pad), 0) + i * tile_b
    col = jax.lax.broadcasted_iota(jnp.int32, (tile_b, A_pad), 1)
    z_masked = jnp.where((row < batch) & (col < A), s2[:, :A_pad], 0.0)
    # sublane-only reduce (no cross-lane XLU reduce / scalar broadcast)
    psum_ref[...] = jnp.sum(z_masked, axis=0, keepdims=True).reshape(psum_ref.shape)


def dueling_q_forward(state, packed_w, packed_b, meta, *,
                      tile_b=1024, core_parallel=False):
    """state: (B, state_size). Returns (B, action_size) Q-values (f32)."""
    B = state.shape[0]
    A, A_pad = meta["action_size"], meta["a_pad"]
    ss, ss_pad = meta["state_size"], meta["ss_pad"]

    tb = _round_up(min(tile_b, _round_up(max(B, 1), SUBLANE)), SUBLANE)
    b_pad = _round_up(B, tb)
    num_tiles = b_pad // tb

    state = state.astype(packed_w.dtype)
    if b_pad != B or ss_pad != ss:
        state = jnp.pad(state, ((0, b_pad - B), (0, ss_pad - ss)))

    in_specs = [
        pl.BlockSpec((tb, ss_pad), lambda i: (i, 0)),       # state tile
        pl.BlockSpec((LANE, 4 * LANE), lambda i: (0, 0)),   # packed weight slab
        pl.BlockSpec((1, 4 * LANE), lambda i: (0, 0)),      # packed bias row (f32)
    ]

    if num_tiles == 1:
        # Fully fused fast path: one grid step, mean-subtract done in-kernel.
        kernel = functools.partial(_dueling_kernel_fused, meta=meta, batch=B, tile_b=tb)
        q_pad = pl.pallas_call(
            kernel,
            out_shape=jax.ShapeDtypeStruct((b_pad, A_pad), jnp.float32),
            grid_spec=pltpu.PrefetchScalarGridSpec(
                num_scalar_prefetch=0,
                grid=(1,),
                in_specs=in_specs,
                out_specs=pl.BlockSpec((tb, A_pad), lambda i: (i, 0)),
            ),
            compiler_params=pltpu.CompilerParams(dimension_semantics=("arbitrary",)),
        )(state, packed_w, packed_b)
        return q_pad[:B, :A]

    # Multi-tile path.  On v7x set core_parallel=True so the batch axis is
    # sharded across both TensorCores (plain "parallel" does not change codegen).
    sem = pltpu.CORE_PARALLEL if core_parallel else "parallel"
    kernel = functools.partial(_dueling_kernel_tiled, meta=meta, batch=B, tile_b=tb)
    q_pad, psums = pl.pallas_call(
        kernel,
        out_shape=(
            jax.ShapeDtypeStruct((b_pad, A_pad), jnp.float32),
            jax.ShapeDtypeStruct((num_tiles, 1, A_pad), jnp.float32),
        ),
        grid_spec=pltpu.PrefetchScalarGridSpec(
            num_scalar_prefetch=0,
            grid=(num_tiles,),
            in_specs=in_specs,
            out_specs=[
                pl.BlockSpec((tb, A_pad), lambda i: (i, 0)),        # Q tile (A_pad lanes)
                pl.BlockSpec((1, 1, A_pad), lambda i: (i, 0, 0)),   # partial z sums
            ],
        ),
        compiler_params=pltpu.CompilerParams(dimension_semantics=(sem,)),
    )(state, packed_w, packed_b)

    # Global mean over batch AND actions (matches torch z.mean() with no dim).
    z_mean = jnp.sum(psums) / (B * A)
    return q_pad[:B, :A] - z_mean


def init_params(key, state_size, action_size,
                fc1_units=16, fc2_units=16,
                val_stream_units=16, adv_stream_units=16):
    """Deterministic synthetic init. Weights stored as (in, out), biases as (1, out)."""
    def linear(k, fan_in, fan_out):
        kw, kb = jax.random.split(k)
        bound = 1.0 / jnp.sqrt(fan_in)  # mimic torch Linear default uniform bound
        w = jax.random.uniform(kw, (fan_in, fan_out), jnp.float32, -bound, bound)
        b = jax.random.uniform(kb, (1, fan_out), jnp.float32, -bound, bound)
        return w, b

    keys = jax.random.split(key, 6)
    w1, b1 = linear(keys[0], state_size, fc1_units)
    w2, b2 = linear(keys[1], fc1_units, fc2_units)
    wv1, bv1 = linear(keys[2], fc2_units, val_stream_units)
    wv2, bv2 = linear(keys[3], val_stream_units, 1)
    wa1, ba1 = linear(keys[4], fc2_units, adv_stream_units)
    wa2, ba2 = linear(keys[5], adv_stream_units, action_size)
    return dict(w1=w1, b1=b1, w2=w2, b2=b2,
                wv1=wv1, bv1=bv1, wv2=wv2, bv2=bv2,
                wa1=wa1, ba1=ba1, wa2=wa2, ba2=ba2)


def reference_forward(state, p):
    relu = lambda t: jnp.maximum(t, 0.0)
    x = relu(state @ p["w1"] + p["b1"])
    x = relu(x @ p["w2"] + p["b2"])
    y = relu(x @ p["wv1"] + p["bv1"])
    y = relu(y @ p["wv2"] + p["bv2"])
    z = relu(x @ p["wa1"] + p["ba1"])
    z = z @ p["wa2"] + p["ba2"]
    return y + (z - jnp.mean(z))


if __name__ == "__main__":
    key = jax.random.PRNGKey(0)
    k_params, k_state, k_state2 = jax.random.split(key, 3)

    batch = 2
    state_size = 8
    action_size = 4

    params = init_params(k_params, state_size, action_size)
    packed_w, packed_b, meta = pack_params(params)   # f32 (use dtype=jnp.bfloat16 for perf)

    # Small batch -> single-tile fully fused path (mean-subtract inside the kernel).
    state = jax.random.normal(k_state, (batch, state_size), jnp.float32)
    out = jax.block_until_ready(dueling_q_forward(state, packed_w, packed_b, meta))
    ref = reference_forward(state, params)
    assert out.shape == (batch, action_size)
    assert jnp.allclose(out, ref, atol=1e-5, rtol=1e-5), (out, ref)

    # Multi-tile check (exercises the batch grid, padding masks and partial sums).
    state2 = jax.random.normal(k_state2, (37, state_size), jnp.float32)
    out2 = jax.block_until_ready(
        dueling_q_forward(state2, packed_w, packed_b, meta, tile_b=16))
    ref2 = reference_forward(state2, params)
    assert out2.shape == (37, action_size)
    assert jnp.allclose(out2, ref2, atol=1e-4, rtol=1e-4), (out2, ref2)

    print("KERNEL_OK")
</pallas_src>

<mosaic_0001>
module attributes {stable_mosaic.version = 11 : i64} {
  func.func @_dueling_kernel_fused(%arg0: i32, %arg1: memref<8x8xf32, #tpu.memory_space<vmem>>, %arg2: memref<128x512xf32, #tpu.memory_space<vmem>>, %arg3: memref<1x512xf32, #tpu.memory_space<vmem>>, %arg4: memref<8x8xf32, #tpu.memory_space<vmem>>) attributes {dimension_semantics = [#tpu.dimension_semantics<arbitrary>], iteration_bounds = array<i64: 1>, scalar_prefetch = 0 : i64, scratch_operands = 0 : i64, tpu.core_type = #tpu.core_type<tc>, window_params = [{transform_indices = @transform_0, window_bounds = array<i64: 8, 8>}, {pipeline_mode = #tpu.pipeline_mode<synchronous>, transform_indices = @transform_1, window_bounds = array<i64: 128, 512>}, {pipeline_mode = #tpu.pipeline_mode<synchronous>, transform_indices = @transform_2, window_bounds = array<i64: 1, 512>}, {transform_indices = @transform_3, window_bounds = array<i64: 8, 8>}]} {
    %c0 = arith.constant 0 : index
    %c0_0 = arith.constant 0 : index
    %0 = vector.load %arg1[%c0, %c0_0] : memref<8x8xf32, #tpu.memory_space<vmem>>, vector<8x8xf32>
    %c0_1 = arith.constant 0 : index
    %c0_2 = arith.constant 0 : index
    %1 = vector.load %arg2[%c0_1, %c0_2] : memref<128x512xf32, #tpu.memory_space<vmem>>, vector<8x128xf32>
    %cst = arith.constant dense<0.000000e+00> : vector<8x128xf32>
    %2 = tpu.matmul %0, %1, %cst {dimension_numbers = #tpu.dot_dimension_numbers<[1], [0], [0], [1], [0, 0, 1, 1], [], []>} : vector<8x8xf32>, vector<8x128xf32>, vector<8x128xf32> -> vector<8x128xf32>
    %c0_3 = arith.constant 0 : index
    %c0_4 = arith.constant 0 : index
    %3 = vector.load %arg3[%c0_3, %c0_4] : memref<1x512xf32, #tpu.memory_space<vmem>>, vector<1x128xf32>
    %4 = vector.broadcast %3 : vector<1x128xf32> to vector<8x128xf32>
    %5 = arith.addf %2, %4 : vector<8x128xf32>
    %cst_5 = arith.constant 0.000000e+00 : f32
    %6 = vector.broadcast %cst_5 : f32 to vector<8x128xf32>
    %7 = arith.maximumf %5, %6 : vector<8x128xf32>
    %c0_6 = arith.constant 0 : index
    %c128 = arith.constant 128 : index
    %8 = vector.load %arg2[%c0_6, %c128] : memref<128x512xf32, #tpu.memory_space<vmem>>, vector<128x128xf32>
    %cst_7 = arith.constant dense<0.000000e+00> : vector<8x128xf32>
    %9 = tpu.matmul %7, %8, %cst_7 {dimension_numbers = #tpu.dot_dimension_numbers<[1], [0], [0], [1], [0, 0, 1, 1], [], []>} : vector<8x128xf32>, vector<128x128xf32>, vector<8x128xf32> -> vector<8x128xf32>
    %c0_8 = arith.constant 0 : index
    %c128_9 = arith.constant 128 : index
    %10 = vector.load %arg3[%c0_8, %c128_9] : memref<1x512xf32, #tpu.memory_space<vmem>>, vector<1x128xf32>
    %11 = vector.broadcast %10 : vector<1x128xf32> to vector<8x128xf32>
    %12 = arith.addf %9, %11 : vector<8x128xf32>
    %cst_10 = arith.constant 0.000000e+00 : f32
    %13 = vector.broadcast %cst_10 : f32 to vector<8x128xf32>
    %14 = arith.maximumf %12, %13 : vector<8x128xf32>
    %c0_11 = arith.constant 0 : index
    %c256 = arith.constant 256 : index
    %15 = vector.load %arg2[%c0_11, %c256] : memref<128x512xf32, #tpu.memory_space<vmem>>, vector<128x128xf32>
    %cst_12 = arith.constant dense<0.000000e+00> : vector<8x128xf32>
    %16 = tpu.matmul %14, %15, %cst_12 {dimension_numbers = #tpu.dot_dimension_numbers<[1], [0], [0], [1], [0, 0, 1, 1], [], []>} : vector<8x128xf32>, vector<128x128xf32>, vector<8x128xf32> -> vector<8x128xf32>
    %c0_13 = arith.constant 0 : index
    %c256_14 = arith.constant 256 : index
    %17 = vector.load %arg3[%c0_13, %c256_14] : memref<1x512xf32, #tpu.memory_space<vmem>>, vector<1x128xf32>
    %18 = vector.broadcast %17 : vector<1x128xf32> to vector<8x128xf32>
    %19 = arith.addf %16, %18 : vector<8x128xf32>
    %cst_15 = arith.constant 0.000000e+00 : f32
    %20 = vector.broadcast %cst_15 : f32 to vector<8x128xf32>
    %21 = arith.maximumf %19, %20 : vector<8x128xf32>
    %c0_16 = arith.constant 0 : index
    %c384 = arith.constant 384 : index
    %22 = vector.load %arg2[%c0_16, %c384] : memref<128x512xf32, #tpu.memory_space<vmem>>, vector<128x128xf32>
    %cst_17 = arith.constant dense<0.000000e+00> : vector<8x128xf32>
    %23 = tpu.matmul %21, %22, %cst_17 {dimension_numbers = #tpu.dot_dimension_numbers<[1], [0], [0], [1], [0, 0, 1, 1], [], []>} : vector<8x128xf32>, vector<128x128xf32>, vector<8x128xf32> -> vector<8x128xf32>
    %c0_18 = arith.constant 0 : index
    %c384_19 = arith.constant 384 : index
    %24 = vector.load %arg3[%c0_18, %c384_19] : memref<1x512xf32, #tpu.memory_space<vmem>>, vector<1x128xf32>
    %25 = vector.broadcast %24 : vector<1x128xf32> to vector<8x128xf32>
    %26 = arith.addf %23, %25 : vector<8x128xf32>
    %27 = vector.extract_strided_slice %26 {offsets = [0, 4], sizes = [8, 1], strides = [1, 1]} : vector<8x128xf32> to vector<8x1xf32>
    %cst_20 = arith.constant 0.000000e+00 : f32
    %28 = vector.broadcast %cst_20 : f32 to vector<8x1xf32>
    %29 = arith.maximumf %27, %28 : vector<8x1xf32>
    %30 = tpu.iota {dimensions = array<i32: 0>} : vector<8x8xi32>
    %31 = tpu.iota {dimensions = array<i32: 1>} : vector<8x8xi32>
    %c2_i32 = arith.constant 2 : i32
    %32 = vector.broadcast %c2_i32 : i32 to vector<8x8xi32>
    %33 = arith.cmpi slt, %30, %32 : vector<8x8xi32>
    %c4_i32 = arith.constant 4 : i32
    %34 = vector.broadcast %c4_i32 : i32 to vector<8x8xi32>
    %35 = arith.cmpi slt, %31, %34 : vector<8x8xi32>
    %36 = arith.andi %33, %35 : vector<8x8xi1>
    %37 = vector.extract_strided_slice %26 {offsets = [0, 0], sizes = [8, 8], strides = [1, 1]} : vector<8x128xf32> to vector<8x8xf32>
    %cst_21 = arith.constant 0.000000e+00 : f32
    %38 = vector.broadcast %cst_21 : f32 to vector<8x8xf32>
    %39 = arith.select %36, %37, %38 : vector<8x8xi1>, vector<8x8xf32>
    %40 = vector.shape_cast %39 : vector<8x8xf32> to vector<1x8x8xf32>
    %cst_22 = arith.constant dense<0.000000e+00> : vector<1xf32>
    %41 = vector.multi_reduction <add>, %40, %cst_22 [1, 2] : vector<1x8x8xf32> to vector<1xf32>
    %42 = vector.shape_cast %41 : vector<1xf32> to vector<1x1x1xf32>
    %43 = vector.extract %42[0, 0, 0] : f32 from vector<1x1x1xf32>
    %cst_23 = arith.constant 1.250000e-01 : f32
    %44 = arith.mulf %43, %cst_23 : f32
    %45 = vector.extract_strided_slice %26 {offsets = [0, 0], sizes = [8, 8], strides = [1, 1]} : vector<8x128xf32> to vector<8x8xf32>
    %46 = vector.broadcast %29 : vector<8x1xf32> to vector<8x8xf32>
    %47 = arith.addf %45, %46 : vector<8x8xf32>
    %48 = vector.broadcast %44 : f32 to vector<8x8xf32>
    %49 = arith.subf %47, %48 : vector<8x8xf32>
    %c0_24 = arith.constant 0 : index
    %c0_25 = arith.constant 0 : index
    %50 = vector.load %arg4[%c0_24, %c0_25] : memref<8x8xf32, #tpu.memory_space<vmem>>, vector<8x8xf32>
    tpu.vector_store %arg4[%c0_24, %c0_25], %49 {strides = array<i32>} : memref<8x8xf32, #tpu.memory_space<vmem>>, vector<8x8xf32>,
    return
  }
  func.func @transform_0(%arg0: i32) -> (i32, i32) {
    %c0_i32 = arith.constant 0 : i32
    %c0_i32_0 = arith.constant 0 : i32
    return %arg0, %c0_i32 : i32, i32
  }
  func.func @transform_1(%arg0: i32) -> (i32, i32) {
    %c0_i32 = arith.constant 0 : i32
    %c0_i32_0 = arith.constant 0 : i32
    %c0_i32_1 = arith.constant 0 : i32
    return %c0_i32, %c0_i32_0 : i32, i32
  }
  func.func @transform_2(%arg0: i32) -> (i32, i32) {
    %c0_i32 = arith.constant 0 : i32
    %c0_i32_0 = arith.constant 0 : i32
    %c0_i32_1 = arith.constant 0 : i32
    return %c0_i32, %c0_i32_0 : i32, i32
  }
  func.func @transform_3(%arg0: i32) -> (i32, i32) {
    %c0_i32 = arith.constant 0 : i32
    %c0_i32_0 = arith.constant 0 : i32
    return %arg0, %c0_i32 : i32, i32
  }
}

</mosaic_0001>

<bundles_post_ra>
// kernel: tpu_custom_call.1
= control target key start
LH: loop header
LB: loop body
LE: loop exit
PB: predicated region body
PF: predicated region fallthrough
CT: control target
= control target key end

     0   :  { %8 = vsyncpa [#allocation3], 0  ;;  %s417_s0 = inlined_call_operand.hbm [shape: f32[8,8], index: 0, kind: input, shape index: {}]   ;;  %s418_s1 = inlined_call_operand.hbm [shape: f32[128,512], index: 1, kind: input, shape index: {}]   ;;  %s419_s2 = inlined_call_operand.hbm [shape: f32[1,512], index: 2, kind: input, shape index: {}]   ;;  %s420_s3 = inlined_call_operand.hbm [shape: f32[8,8], index: 3, kind: output, shape index: {}]  }
   0x1   :  { %9 = vsyncpa [#allocation6], 0  ;;  %s26_s14 = sshll.u32 %s418_s1, 4  ;;  %s27_s14 = int_to_ptr.hbm [resolvable:$true] %s26_s14 }
   0x2   :  { %10 = vsyncpa [#allocation4], 0  ;;  %s375_s15 = smov [#allocation5]   ;;  %s16_s19 = sshll.u32 %s417_s0, 4  ;;  %s17_s19 = int_to_ptr.hbm [resolvable:$true] %s16_s19 }
   0x3   :  { %s28_s16 = sshll.u32 %s375_s15, 4  ;;  %s376_s20 = smov 512   ;;  %s29_s16 = int_to_ptr.vmem [resolvable:$true] %s28_s16 }
   0x4   :  { %s377_s21 = smov 32   ;;  %s378_s22 = smov [#allocation2]  }
   0x5   :  { %34 = dma.hbm_to_vmem [thread:$0]  %s27_s14, 8192, %s29_s16, [#allocation6], %s376_s20, %s376_s20, %s377_s21  }
   0x6   :  { %s18_s23 = sshll.u32 %s378_s22, 4  ;;  %s40_s26 = sshll.u32 %s419_s2, 4  ;;  %s19_s23 = int_to_ptr.vmem [resolvable:$true] %s18_s23  ;;  %s41_s26 = int_to_ptr.hbm [resolvable:$true] %s40_s26 }
   0x7   :  { %21 = dma.hbm_to_vmem [thread:$0]  %s17_s19, 128, %s19_s23, [#allocation3]  }
   0x8   :  { %s379_s1 = smov [#allocation7]  }
   0x9   :  { %s42_s27 = sshll.u32 %s379_s1, 4  ;;  %s43_s27 = int_to_ptr.vmem [resolvable:$true] %s42_s27 }
   0xa   :  { %45 = dma.hbm_to_vmem [thread:$0]  %s41_s26, 64, %s43_s27, [#allocation6]  }
   0xb   :  { %369 = dma.done.wait [#allocation3], 128  }
   0xc   :  { %370 = vsyncadd [#allocation3], 4294967168 }
   0xd   :  { %371 = dma.done.wait [#allocation6], 8256  }
   0xe   :  { %372 = vsyncadd [#allocation6], 4294959040  ;;  %vm64_vm0 = vcmask 64512   ;;  %v59_v0 = vld [vmem:[#allocation5] sm:$0xff]  ;;  %v58_v1 = vld [vmem:[#allocation2] sm:$0xff]  ;;  %v380_v62 = vmov 4   ;;  %v212_v63 = vlaneseq }
   0xf   :  { %v104_v2 = vld [vmem:[#allocation5 + $0x1e8] sm:$0xff]  ;;  %83 = vmatpush.msra.mxu0 %v59_v0  ;;  %v145_v18 = vld [vmem:[#allocation5 + $0x1f0] sm:$0xff]  ;;  %v269_v31 = vld [vmem:[#allocation7] ss:$0 sm:$0xff]  ;;  %268 = vset.pattern.permute.xlu0 %v380_v62  ;;  %s381_s2 = smov [#allocation8]   ;;  %s247_s5 = sshll.u32 %s420_s3, 4  ;;  %s248_s5 = int_to_ptr.hbm [resolvable:$true] %s247_s5 }
  0x10   :  { %109 = vmatpush.msra.mxu1 %v104_v2  ;;  %v103_v3 = vld [vmem:[#allocation5 + $0x1c8] sm:$0xff]  ;;  %258 = vmatmul.msk.f32.vlgmr.msra.gmra.mxu0 %vm64_vm0, %v58_v1  ;;  %v144_v19 = vld [vmem:[#allocation5 + $0x1d0] sm:$0xff]  ;;  %v186_v38 = vld [vmem:[#allocation5 + $0x1f8] sm:$0xff]  ;;  %v213_v0 = vshrl.u32 %v212_v63, 7  ;;  %v215_v1 = vand.u32 127, %v212_v63  ;;  %s245_s28 = sshll.u32 %s381_s2, 4  ;;  %s246_s28 = int_to_ptr.vmem [resolvable:$true] %s245_s28 }
  0x11   :  { %v102_v4 = vld [vmem:[#allocation5 + $0x1a8] sm:$0xff]  ;;  %150 = vmatpush.msra.mxu2 %v145_v18  ;;  %v143_v20 = vld [vmem:[#allocation5 + $0x1b0] sm:$0xff]  ;;  %v185_v39 = vld [vmem:[#allocation5 + $0x1d8] sm:$0xff]  ;;  %191 = vmatpush.msra.mxu3 %v186_v38 }
  0x12   :  { %110 = vmatpush.msra.mxu1 %v103_v3  ;;  %v101_v5 = vld [vmem:[#allocation5 + $0x188] sm:$0xff]  ;;  %v142_v21 = vld [vmem:[#allocation5 + $0x190] sm:$0xff]  ;;  %v184_v40 = vld [vmem:[#allocation5 + $0x1b8] sm:$0xff]  ;;  %vm216_vm1 = vcmp.lt.s32.totalorder %v213_v0, 2  ;;  %vm217_vm2 = vcmp.lt.s32.totalorder %v215_v1, 4 }
  0x13   :  { %v100_v6 = vld [vmem:[#allocation5 + $0x168] sm:$0xff]  ;;  %151 = vmatpush.msra.mxu2 %v144_v19  ;;  %v141_v22 = vld [vmem:[#allocation5 + $0x170] sm:$0xff]  ;;  %192 = vmatpush.msra.mxu3 %v185_v39  ;;  %v183_v41 = vld [vmem:[#allocation5 + $0x198] sm:$0xff] }
  0x14   :  { %111 = vmatpush.msra.mxu1 %v102_v4  ;;  %v99_v7 = vld [vmem:[#allocation5 + $0x148] sm:$0xff]  ;;  %v140_v23 = vld [vmem:[#allocation5 + $0x150] sm:$0xff]  ;;  %v182_v42 = vld [vmem:[#allocation5 + $0x178] sm:$0xff] }
  0x15   :  { %v98_v8 = vld [vmem:[#allocation5 + $0x128] sm:$0xff]  ;;  %152 = vmatpush.msra.mxu2 %v143_v20  ;;  %v139_v24 = vld [vmem:[#allocation5 + $0x130] sm:$0xff]  ;;  %193 = vmatpush.msra.mxu3 %v184_v40  ;;  %v181_v43 = vld [vmem:[#allocation5 + $0x158] sm:$0xff] }
  0x16   :  { %112 = vmatpush.msra.mxu1 %v101_v5  ;;  %v97_v9 = vld [vmem:[#allocation5 + $0x108] sm:$0xff]  ;;  %v138_v25 = vld [vmem:[#allocation5 + $0x110] sm:$0xff]  ;;  %v180_v44 = vld [vmem:[#allocation5 + $0x138] sm:$0xff] }
  0x17   :  { %v96_v10 = vld [vmem:[#allocation5 + $0xe8] sm:$0xff]  ;;  %153 = vmatpush.msra.mxu2 %v142_v21  ;;  %v137_v26 = vld [vmem:[#allocation5 + $0xf0] sm:$0xff]  ;;  %194 = vmatpush.msra.mxu3 %v183_v41  ;;  %v179_v45 = vld [vmem:[#allocation5 + $0x118] sm:$0xff] }
  0x18   :  { %113 = vmatpush.msra.mxu1 %v100_v6  ;;  %v95_v11 = vld [vmem:[#allocation5 + $0xc8] sm:$0xff]  ;;  %v136_v27 = vld [vmem:[#allocation5 + $0xd0] sm:$0xff]  ;;  %v178_v46 = vld [vmem:[#allocation5 + $0xf8] sm:$0xff] }
  0x19   :  { %v94_v12 = vld [vmem:[#allocation5 + $0xa8] sm:$0xff]  ;;  %154 = vmatpush.msra.mxu2 %v141_v22  ;;  %v135_v28 = vld [vmem:[#allocation5 + $0xb0] sm:$0xff]  ;;  %195 = vmatpush.msra.mxu3 %v182_v42  ;;  %v177_v47 = vld [vmem:[#allocation5 + $0xd8] sm:$0xff] }
  0x1a   :  { %114 = vmatpush.msra.mxu1 %v99_v7  ;;  %v93_v13 = vld [vmem:[#allocation5 + $0x88] sm:$0xff]  ;;  %v134_v29 = vld [vmem:[#allocation5 + $0x90] sm:$0xff]  ;;  %v176_v48 = vld [vmem:[#allocation5 + $0xb8] sm:$0xff] }
  0x1b   :  { %v92_v14 = vld [vmem:[#allocation5 + $0x68] sm:$0xff]  ;;  %155 = vmatpush.msra.mxu2 %v140_v23  ;;  %v133_v30 = vld [vmem:[#allocation5 + $0x70] sm:$0xff]  ;;  %196 = vmatpush.msra.mxu3 %v181_v43  ;;  %v175_v49 = vld [vmem:[#allocation5 + $0x98] sm:$0xff] }
  0x1c   :  { %115 = vmatpush.msra.mxu1 %v98_v8  ;;  %v91_v15 = vld [vmem:[#allocation5 + $0x48] sm:$0xff]  ;;  %v132_v35 = vld [vmem:[#allocation5 + $0x50] sm:$0xff]  ;;  %v174_v50 = vld [vmem:[#allocation5 + $0x78] sm:$0xff] }
  0x1d   :  { %v90_v16 = vld [vmem:[#allocation5 + $0x28] sm:$0xff]  ;;  %156 = vmatpush.msra.mxu2 %v139_v24  ;;  %v131_v36 = vld [vmem:[#allocation5 + $0x30] sm:$0xff]  ;;  %197 = vmatpush.msra.mxu3 %v180_v44  ;;  %v270_v51 = vld [vmem:[#allocation7 + $0x1] ss:$0 sm:$0xff] }
  0x1e   :  { %116 = vmatpush.msra.mxu1 %v97_v9  ;;  %v89_v17 = vld [vmem:[#allocation5 + $0x8] sm:$0xff]  ;;  %v130_v37 = vld [vmem:[#allocation5 + $0x10] sm:$0xff]  ;;  %v173_v55 = vld [vmem:[#allocation5 + $0x58] sm:$0xff] }
  0x1f   :  { %157 = vmatpush.msra.mxu2 %v138_v25  ;;  %198 = vmatpush.msra.mxu3 %v179_v45  ;;  %v172_v56 = vld [vmem:[#allocation5 + $0x38] sm:$0xff]  ;;  %v271_v58 = vld [vmem:[#allocation7 + $0x2] ss:$0 sm:$0xff]  ;;  %v272_v2 = vld [vmem:[#allocation7 + $0x3] ss:$0 sm:$0xff] }
  0x20   :  { %117 = vmatpush.msra.mxu1 %v96_v10  ;;  %v171_v57 = vld [vmem:[#allocation5 + $0x18] sm:$0xff]  ;;  %vm218_vm3 = vmand %vm216_vm1, %vm217_vm2 }
  0x21   :  { %158 = vmatpush.msra.mxu2 %v137_v26  ;;  %199 = vmatpush.msra.mxu3 %v178_v46 }
  0x22   :  { %118 = vmatpush.msra.mxu1 %v95_v11 }
  0x23   :  { %159 = vmatpush.msra.mxu2 %v136_v27  ;;  %200 = vmatpush.msra.mxu3 %v177_v47 }
  0x24   :  { %119 = vmatpush.msra.mxu1 %v94_v12 }
  0x25   :  { %160 = vmatpush.msra.mxu2 %v135_v28  ;;  %201 = vmatpush.msra.mxu3 %v176_v48 }
  0x26   :  { %120 = vmatpush.msra.mxu1 %v93_v13 }
  0x27   :  { %161 = vmatpush.msra.mxu2 %v134_v29  ;;  %202 = vmatpush.msra.mxu3 %v175_v49 }
  0x28   :  { %121 = vmatpush.msra.mxu1 %v92_v14 }
  0x29   :  { %162 = vmatpush.msra.mxu2 %v133_v30  ;;  %203 = vmatpush.msra.mxu3 %v174_v50 }
  0x2a   :  { %122 = vmatpush.msra.mxu1 %v91_v15 }
  0x2b   :  { %163 = vmatpush.msra.mxu2 %v132_v35  ;;  %204 = vmatpush.msra.mxu3 %v173_v55 }
  0x2c   :  { %123 = vmatpush.msra.mxu1 %v90_v16 }
  0x2d   :  { %164 = vmatpush.msra.mxu2 %v131_v36  ;;  %205 = vmatpush.msra.mxu3 %v172_v56 }
  0x2e   :  { %124 = vmatpush.msra.mxu1 %v89_v17 }
  0x2f   :  { %165 = vmatpush.msra.mxu2 %v130_v37  ;;  %206 = vmatpush.msra.mxu3 %v171_v57 }
  0x8d   :  { %v85_v32 = vpop.f32.mrf.mxu0 }
  0x8e   :  { %v86_v33 = vadd.f32 %v269_v31, %v85_v32 }
  0x90   :  { %v88_v34 = vmax.f32 %v86_v33, 0.0 }
  0x92   :  { %125 = vmatmul.f32.vlgmr.msra.gmra.mxu1 %v88_v34 }
 0x10f   :  { %v126_v52 = vpop.f32.mrf.mxu1 }
 0x110   :  { %v127_v53 = vadd.f32 %v270_v51, %v126_v52 }
 0x112   :  { %v129_v54 = vmax.f32 %v127_v53, 0.0 }
 0x114   :  { %166 = vmatmul.f32.vlgmr.msra.gmra.mxu2 %v129_v54 }
 0x197   :  { %v167_v59 = vpop.f32.mrf.mxu2 }
 0x198   :  { %v168_v60 = vadd.f32 %v271_v58, %v167_v59 }
 0x19a   :  { %v170_v61 = vmax.f32 %v168_v60, 0.0 }
 0x19c   :  { %207 = vmatmul.f32.vlgmr.msra.gmra.mxu3 %v170_v61 }
 0x21f   :  { %v208_v3 = vpop.f32.mrf.mxu3 }
 0x220   :  { %v209_v4 = vadd.f32 %v272_v2, %v208_v3 }
 0x222   :  { %v219_v5 = vsel %vm218_vm3, %v209_v4, 0.0  ;;  %v211_v7 = vmax.f32 %v209_v4, 0.0 }
 0x223   :  { %v220_v6 = vsel %vm64_vm0, %v219_v5, 0.0 }
 0x224   :  { %221 = vadd.xlane.f32.xlu0 %v220_v6 }
 0x238   :  { %233 = vperm.xlu0 %268, %v211_v7  }
 0x297   :  { %v222_v8 = vpop.xlane.xlu0 %221 }
 0x298   :  { %v223_v9 = vrot.slane %v222_v8, 4 }
 0x29a   :  { %v224_v10 = vadd.f32 %v223_v9, %v222_v8 }
 0x29c   :  { %v225_v11 = vrot.slane %v224_v10, 2 }
 0x29e   :  { %v226_v12 = vadd.f32 %v225_v11, %v224_v10 }
 0x2a0   :  { %v227_v13 = vrot.slane %v226_v12, 1 }
 0x2a2   :  { %v228_v14 = vadd.f32 %v227_v13, %v226_v12 }
 0x2a4   :  { %259 = vpush %v228_v14 }
 0x2aa   :  { %v234_v15 = vpop.permute.xlu0 %233 }
 0x2ab   :  { %v236_v16 = vadd.f32 %v234_v15, %v209_v4 }
 0x2d5   :  { %s260_s0 = spop %259 }
 0x2d6   :  { %s230_s29 = smul.f32 0.125, %s260_s0 }
 0x2d8   :  { %v237_v17 = vstv %s230_s29 }
 0x2d9   :  { %v238_v18 = vsub.f32 %v236_v16, %v237_v17 }
 0x2db   :  { %239 = vst.msk [vmem:[#allocation8] sm:$0xff] %vm64_vm0, %v238_v18 }
 0x2dc   :  { %250 = dma.vmem_to_hbm [thread:$0]  %s246_s28, 128, %s248_s5, [#allocation4]  }
 0x2dd   :  { %373 = dma.done.wait [#allocation4], 128  }
 0x2de   :  { %374 = vsyncadd [#allocation4], 4294967168 }
 0x2df   :  { %255 = vsyncpa [#allocation3], 1 }
 0x2e0   :  { %256 = vsyncpa [#allocation6], 1 }
 0x2e1   :  { %257 = vsyncpa [#allocation4], 1 }

</bundles_post_ra>
